<compile_context>
chip_gen: v7x
topology: tpu7x:2x2x1
jax: 0.10.0
libtpu: 0.0.40
codegen_flags: <defaults>
</compile_context>

<pallas_src>
import functools

import jax
import jax.numpy as jnp
from jax.experimental import pallas as pl


# ----------------------------------------------------------------------------
# Pallas kernel: all psi nets, all layers, one invocation, one matmul/layer.
# ----------------------------------------------------------------------------
def _td3_psi_kernel(obs_ref, act_ref, w1_ref, w2_ref, w3_ref, b_ref, o_ref,
                    *, obs_dim, nh, n_out):
    obs = obs_ref[...]                                   # (B, obs_dim)
    act = act_ref[...]                                   # (B, act_dim)

    # Layer 1: one wide matmul across all nets.  w1_ref is (in_dim, n*H) with
    # the obs rows first; obs_dim % 8 == 0, so these static sublane slices are
    # zero-cost views and cat(obs, act) is never built:
    #   h1 = obs @ W1[:obs_dim] + act @ W1[obs_dim:] + b1
    h1 = (jnp.dot(obs, w1_ref[:obs_dim, :], preferred_element_type=jnp.float32)
          + jnp.dot(act, w1_ref[obs_dim:, :], preferred_element_type=jnp.float32)
          + b_ref[0:1, :nh])
    h1 = jnp.maximum(h1, 0.0)                            # (B, n*H)

    # Layer 2: block-diagonal fused weight -> one MXU op for all nets.
    h2 = (jnp.dot(h1, w2_ref[...], preferred_element_type=jnp.float32)
          + b_ref[1:2, :nh])
    h2 = jnp.maximum(h2, 0.0)                            # (B, n*H)

    # Layer 3: block-diagonal; result is already lane-concatenated per net.
    out = (jnp.dot(h2, w3_ref[...], preferred_element_type=jnp.float32)
           + b_ref[2:3, :n_out])
    o_ref[...] = out.astype(o_ref.dtype)                 # (B, n*out)


def td3_psi_forward(obs, actions, fused, *, n_nets, out_dim):
    """Pallas implementation of TD3PsiNetwork.forward.

    Args:
      obs:     (B, representation_dim) float32
      actions: (B, prod(action_shape)) float32
      fused:   dict produced once by `fuse_params` (init-time weight fusion).

    Returns:
      list of n_nets arrays, each (B, 1, out_dim)  — matches
      `[psi_net(x).unsqueeze(1) for psi_net in self._psi_nets]`.
    """
    w1_all, w2_blk = fused["w1_all"], fused["w2_blk"]
    w3_blk, bias = fused["w3_blk"], fused["bias"]

    batch, obs_dim = obs.shape
    in_dim, nh = w1_all.shape
    n_out = w3_blk.shape[-1]
    assert in_dim == obs_dim + actions.shape[-1]
    assert n_out == n_nets * out_dim
    # Zero-cost in-kernel split of W1 requires sublane-aligned obs rows.
    assert obs_dim % 8 == 0, "obs_dim must be a multiple of 8 for split path"

    kernel = functools.partial(_td3_psi_kernel,
                               obs_dim=obs_dim, nh=nh, n_out=n_out)

    # Single invocation, no grid: every operand is a whole-array VMEM block
    # (a few KiB total, far below the scoped VMEM limit).  6 input DMAs.
    stacked = pl.pallas_call(
        kernel,
        out_shape=jax.ShapeDtypeStruct((batch, n_out), jnp.float32),
    )(obs, actions, w1_all, w2_blk, w3_blk, bias)        # (B, n*out)

    # forward() returns a list of per-net outputs with an inserted dim 1.
    stacked = stacked.reshape(batch, n_nets, out_dim)
    return list(jnp.split(stacked, n_nets, axis=1))      # n x (B, 1, out)


# ----------------------------------------------------------------------------
# One-time (init-time) parameter fusion: NOT on the per-call path.
# ----------------------------------------------------------------------------
def _block_diag(blocks):
    rows = []
    for i, blk in enumerate(blocks):
        row = [blk if j == i else jnp.zeros((blk.shape[0], b.shape[1]), blk.dtype)
               for j, b in enumerate(blocks)]
        rows.append(jnp.concatenate(row, axis=1))
    return jnp.concatenate(rows, axis=0)


def fuse_params(params):
    """Fuse per-net weights into wide / block-diagonal fused weights (once)."""
    w1, b1 = params["w1"], params["b1"]      # (n, in, H), (n, 1, H)
    w2, b2 = params["w2"], params["b2"]      # (n, H, H),  (n, 1, H)
    w3, b3 = params["w3"], params["b3"]      # (n, H, out),(n, 1, out)
    n, in_dim, hidden = w1.shape
    out_dim = w3.shape[-1]
    nh, n_out = n * hidden, n * out_dim

    w1_all = jnp.concatenate([w1[i] for i in range(n)], axis=-1)  # (in, n*H)
    w2_blk = _block_diag([w2[i] for i in range(n)])               # (n*H, n*H)
    w3_blk = _block_diag([w3[i] for i in range(n)])               # (n*H, n*out)

    b1_all = jnp.concatenate([b1[i] for i in range(n)], axis=-1)  # (1, n*H)
    b2_all = jnp.concatenate([b2[i] for i in range(n)], axis=-1)  # (1, n*H)
    b3_all = jnp.concatenate([b3[i] for i in range(n)], axis=-1)  # (1, n*out)

    bias_w = max(nh, n_out)
    pad = lambda v: jnp.pad(v, ((0, 0), (0, bias_w - v.shape[-1])))
    bias = jnp.concatenate([pad(b1_all), pad(b2_all), pad(b3_all)], axis=0)

    return {"w1_all": w1_all, "w2_blk": w2_blk, "w3_blk": w3_blk, "bias": bias}


# ----------------------------------------------------------------------------
# Deterministic per-net parameter construction (synthetic, no checkpoint).
# ----------------------------------------------------------------------------
def init_params(key, n_nets, in_dim, hidden, out_dim):
    ks = jax.random.split(key, 6)
    s1 = 1.0 / jnp.sqrt(in_dim)
    s2 = 1.0 / jnp.sqrt(hidden)
    return {
        "w1": jax.random.uniform(ks[0], (n_nets, in_dim, hidden),
                                 jnp.float32, -s1, s1),
        "b1": jax.random.uniform(ks[1], (n_nets, 1, hidden),
                                 jnp.float32, -s1, s1),
        "w2": jax.random.uniform(ks[2], (n_nets, hidden, hidden),
                                 jnp.float32, -s2, s2),
        "b2": jax.random.uniform(ks[3], (n_nets, 1, hidden),
                                 jnp.float32, -s2, s2),
        "w3": jax.random.uniform(ks[4], (n_nets, hidden, out_dim),
                                 jnp.float32, -s2, s2),
        "b3": jax.random.uniform(ks[5], (n_nets, 1, out_dim),
                                 jnp.float32, -s2, s2),
    }


def reference_forward(obs, actions, params):
    """Pure-JAX reference mirroring the PyTorch semantics (with concat)."""
    x = jnp.concatenate([obs, actions], axis=-1)
    outs = []
    for i in range(params["w1"].shape[0]):
        h1 = jnp.maximum(x @ params["w1"][i] + params["b1"][i], 0.0)
        h2 = jnp.maximum(h1 @ params["w2"][i] + params["b2"][i], 0.0)
        o = h2 @ params["w3"][i] + params["b3"][i]
        outs.append(o[:, None, :])
    return outs


if __name__ == "__main__":
    # Small shapes consistent with the module's __init__.
    batch = 8
    representation_dim = 24          # multiple of 8 -> aligned split slices
    action_shape = (8,)              # prod = 8  -> in_dim = 32
    output_dim = 16
    hidden = 32
    n_psi_nets = 2

    in_dim = representation_dim + int(jnp.prod(jnp.array(action_shape)))

    key = jax.random.PRNGKey(0)
    k_obs, k_act, k_par = jax.random.split(key, 3)
    obs = jax.random.normal(k_obs, (batch, representation_dim), jnp.float32)
    actions = jax.random.normal(k_act, (batch,) + action_shape, jnp.float32)
    actions_flat = actions.reshape(batch, -1)

    params = init_params(k_par, n_psi_nets, in_dim, hidden, output_dim)
    fused = fuse_params(params)      # init-time fusion, not per call

    outs = td3_psi_forward(obs, actions_flat, fused,
                           n_nets=n_psi_nets, out_dim=output_dim)
    outs = [jax.block_until_ready(o) for o in outs]

    refs = reference_forward(obs, actions_flat, params)
    for o, r in zip(outs, refs):
        assert o.shape == (batch, 1, output_dim), o.shape
        assert jnp.allclose(o, r, atol=1e-4, rtol=1e-4), \
            float(jnp.max(jnp.abs(o - r)))

    print("KERNEL_OK")
</pallas_src>

<mosaic_0001>
module attributes {stable_mosaic.version = 11 : i64} {
  func.func @_td3_psi_kernel(%arg0: memref<8x24xf32, #tpu.memory_space<vmem>>, %arg1: memref<8x8xf32, #tpu.memory_space<vmem>>, %arg2: memref<32x64xf32, #tpu.memory_space<vmem>>, %arg3: memref<64x64xf32, #tpu.memory_space<vmem>>, %arg4: memref<64x32xf32, #tpu.memory_space<vmem>>, %arg5: memref<3x64xf32, #tpu.memory_space<vmem>>, %arg6: memref<8x32xf32, #tpu.memory_space<vmem>>) attributes {dimension_semantics = [], scalar_prefetch = 0 : i64, scratch_operands = 0 : i64, tpu.core_type = #tpu.core_type<tc>} {
    %c0 = arith.constant 0 : index
    %c0_0 = arith.constant 0 : index
    %0 = vector.load %arg0[%c0, %c0_0] : memref<8x24xf32, #tpu.memory_space<vmem>>, vector<8x24xf32>
    %c0_1 = arith.constant 0 : index
    %c0_2 = arith.constant 0 : index
    %1 = vector.load %arg1[%c0_1, %c0_2] : memref<8x8xf32, #tpu.memory_space<vmem>>, vector<8x8xf32>
    %c0_3 = arith.constant 0 : index
    %c0_4 = arith.constant 0 : index
    %2 = vector.load %arg2[%c0_3, %c0_4] : memref<32x64xf32, #tpu.memory_space<vmem>>, vector<24x64xf32>
    %cst = arith.constant dense<0.000000e+00> : vector<8x64xf32>
    %3 = tpu.matmul %0, %2, %cst {dimension_numbers = #tpu.dot_dimension_numbers<[1], [0], [0], [1], [0, 0, 1, 1], [], []>} : vector<8x24xf32>, vector<24x64xf32>, vector<8x64xf32> -> vector<8x64xf32>
    %c24 = arith.constant 24 : index
    %c0_5 = arith.constant 0 : index
    %4 = vector.load %arg2[%c24, %c0_5] : memref<32x64xf32, #tpu.memory_space<vmem>>, vector<8x64xf32>
    %cst_6 = arith.constant dense<0.000000e+00> : vector<8x64xf32>
    %5 = tpu.matmul %1, %4, %cst_6 {dimension_numbers = #tpu.dot_dimension_numbers<[1], [0], [0], [1], [0, 0, 1, 1], [], []>} : vector<8x8xf32>, vector<8x64xf32>, vector<8x64xf32> -> vector<8x64xf32>
    %6 = arith.addf %3, %5 : vector<8x64xf32>
    %c0_7 = arith.constant 0 : index
    %c0_8 = arith.constant 0 : index
    %7 = vector.load %arg5[%c0_7, %c0_8] : memref<3x64xf32, #tpu.memory_space<vmem>>, vector<1x64xf32>
    %8 = vector.broadcast %7 : vector<1x64xf32> to vector<8x64xf32>
    %9 = arith.addf %6, %8 : vector<8x64xf32>
    %cst_9 = arith.constant 0.000000e+00 : f32
    %10 = vector.broadcast %cst_9 : f32 to vector<8x64xf32>
    %11 = arith.maximumf %9, %10 : vector<8x64xf32>
    %c0_10 = arith.constant 0 : index
    %c0_11 = arith.constant 0 : index
    %12 = vector.load %arg3[%c0_10, %c0_11] : memref<64x64xf32, #tpu.memory_space<vmem>>, vector<64x64xf32>
    %cst_12 = arith.constant dense<0.000000e+00> : vector<8x64xf32>
    %13 = tpu.matmul %11, %12, %cst_12 {dimension_numbers = #tpu.dot_dimension_numbers<[1], [0], [0], [1], [0, 0, 1, 1], [], []>} : vector<8x64xf32>, vector<64x64xf32>, vector<8x64xf32> -> vector<8x64xf32>
    %c1 = arith.constant 1 : index
    %c0_13 = arith.constant 0 : index
    %14 = vector.load %arg5[%c1, %c0_13] : memref<3x64xf32, #tpu.memory_space<vmem>>, vector<1x64xf32>
    %15 = vector.broadcast %14 : vector<1x64xf32> to vector<8x64xf32>
    %16 = arith.addf %13, %15 : vector<8x64xf32>
    %cst_14 = arith.constant 0.000000e+00 : f32
    %17 = vector.broadcast %cst_14 : f32 to vector<8x64xf32>
    %18 = arith.maximumf %16, %17 : vector<8x64xf32>
    %c0_15 = arith.constant 0 : index
    %c0_16 = arith.constant 0 : index
    %19 = vector.load %arg4[%c0_15, %c0_16] : memref<64x32xf32, #tpu.memory_space<vmem>>, vector<64x32xf32>
    %cst_17 = arith.constant dense<0.000000e+00> : vector<8x32xf32>
    %20 = tpu.matmul %18, %19, %cst_17 {dimension_numbers = #tpu.dot_dimension_numbers<[1], [0], [0], [1], [0, 0, 1, 1], [], []>} : vector<8x64xf32>, vector<64x32xf32>, vector<8x32xf32> -> vector<8x32xf32>
    %c2 = arith.constant 2 : index
    %c0_18 = arith.constant 0 : index
    %21 = vector.load %arg5[%c2, %c0_18] : memref<3x64xf32, #tpu.memory_space<vmem>>, vector<1x32xf32>
    %22 = vector.broadcast %21 : vector<1x32xf32> to vector<8x32xf32>
    %23 = arith.addf %20, %22 : vector<8x32xf32>
    %c0_19 = arith.constant 0 : index
    %c0_20 = arith.constant 0 : index
    %24 = vector.load %arg6[%c0_19, %c0_20] : memref<8x32xf32, #tpu.memory_space<vmem>>, vector<8x32xf32>
    tpu.vector_store %arg6[%c0_19, %c0_20], %23 {strides = array<i32>} : memref<8x32xf32, #tpu.memory_space<vmem>>, vector<8x32xf32>,
    return
  }
}

</mosaic_0001>

<bundles_post_ra>
// kernel: tpu_custom_call.1
= control target key start
LH: loop header
LB: loop body
LE: loop exit
PB: predicated region body
PF: predicated region fallthrough
CT: control target
= control target key end

     0   :  { %11 = vsyncpa [#allocation3], 0  ;;  %s691_s0 = inlined_call_operand.vmem [shape: f32[8,24], index: 0, kind: input, shape index: {}]   ;;  %s692_s1 = inlined_call_operand.hbm [shape: f32[8,8], index: 1, kind: input, shape index: {}]   ;;  %s693_s2 = inlined_call_operand.vmem [shape: f32[32,64], index: 2, kind: input, shape index: {}]   ;;  %s694_s3 = inlined_call_operand.vmem [shape: f32[64,64], index: 3, kind: input, shape index: {}]   ;;  %s695_s4 = inlined_call_operand.vmem [shape: f32[64,32], index: 4, kind: input, shape index: {}]   ;;  %s696_s5 = inlined_call_operand.vmem [shape: f32[3,64], index: 5, kind: input, shape index: {}]   ;;  %s697_s6 = inlined_call_operand.hbm [shape: f32[8,32], index: 6, kind: output, shape index: {}]  }
   0x1   :  { %12 = vsyncpa [#allocation4], 0  ;;  %s551_s21 = smov [#allocation2]   ;;  %s503_s25 = scalar_lea.hbm %s692_s1, 128 }
   0x2   :  { %s21_s22 = sshll.u32 %s551_s21, 4  ;;  %p504_p0 = scmp.ne.s32.totalorder %s692_s1, %s503_s25  ;;  %s22_s22 = int_to_ptr.vmem [resolvable:$true] %s21_s22 }
   0x3   :  { %p507_p1 = scmp.lt.u32.totalorder %s503_s25, %s692_s1 }
   0x5   :  { %p509_p2 = pnand %p507_p1, %p504_p0 }
   0x7   :  { %512 = shalt.err (!%p509_p2)
}
   0x8   :  { %s513_s30 = scalar_lea.vmem %s22_s22, 128  ;;  %p518_p4 = scmp.lt.s32.totalorder %s22_s22, %s22_s22 }
   0x9   :  { %p514_p3 = scmp.ne.s32.totalorder %s22_s22, %s513_s30  ;;  %p519_p5 = scmp.lt.s32.totalorder %s513_s30, %s513_s30 }
   0xb   :  { %p520_p6 = por %p519_p5, %p518_p4 }
   0xd   :  { %p521_p7 = pnand %p520_p6, %p514_p3 }
   0xf   :  { %524 = shalt.err (!%p521_p7)
}
  0x10   :  { %24 = dma.hbm_to_vmem [thread:$0]  %s692_s1, 128, %s22_s22, [#allocation3]  }
  0x11   :  { %547 = dma.done.wait [#allocation3], 128  }
  0x12   :  { %548 = vsyncadd [#allocation3], 4294967168  ;;  %v552_v0 = vmov 0.0|0.0   ;;  %v553_v1 = vmov 0.0   ;;  %vm554_vm0 = vmmov 0   ;;  %vm42_vm1 = vcmask 64512  }
  0x13   :  { %471 = vmatprep.subr.bf16.mxu1 %v552_v0  ;;  %419 = vmatprep.subr.mxu0 %v553_v1  ;;  %v38_v2 = vld [vmem:[%s693_s2] sm:$0xff]  ;;  %v39_v3 = vld [vmem:[%s693_s2 + $0x8] sm:$0xff]  ;;  %v41_v4 = vld [vmem:[%s693_s2 + $0x18] sm:$0xff]  ;;  %vm116_vm2 = vcmask 195584   ;;  %vm210_vm3 = vcmask 523264   ;;  %vm371_vm4 = vcmask 261120  }
  0x14   :  { %421 = vmatprep.mubr.msk.f32.mxu0 %vm554_vm0, %v553_v1  ;;  %430 = vmatprep.mubr.msk.f32.mxu1 %vm554_vm0, %v553_v1  ;;  %v472_v5 = vpack.c.bf16 %v39_v3, %v38_v2  ;;  %v37_v6 = vld [vmem:[#allocation2] sm:$0xff]  ;;  %v198_v8 = vld [vmem:[%s694_s3 + $0x8] sm:$0xff]  ;;  %v199_v9 = vld [vmem:[%s694_s3 + $0x10] sm:$0xff] }
  0x15   :  { %420 = vmatpush3.msra.mxu0 %v41_v4  ;;  %v197_v7 = vld [vmem:[%s694_s3] sm:$0xff]  ;;  %v200_v11 = vld [vmem:[%s694_s3 + $0x18] sm:$0xff]  ;;  %v40_v12 = vld [vmem:[%s693_s2 + $0x10] sm:$0xff]  ;;  %s555_s2 = smov [#allocation5]  }
  0x16   :  { %422 = vmatmul.mubr.msk.f32.vlgmr.msra.gmra.mrb[0].mxu0 %vm42_vm1, %v37_v6  ;;  %474 = vmatprep.subr.bf16.mxu0 %v552_v0  ;;  %v475_v10 = vpack.c.bf16 %v198_v8, %v197_v7  ;;  %v36_v13 = vld [vmem:[%s691_s0] sm:$0xff]  ;;  %v478_v14 = vpack.c.bf16 %v200_v11, %v199_v9  ;;  %v202_v16 = vld [vmem:[%s694_s3 + $0x28] sm:$0xff]  ;;  %v203_v18 = vld [vmem:[%s694_s3 + $0x30] sm:$0xff]  ;;  %s379_s28 = sshll.u32 %s555_s2, 4  ;;  %s380_s28 = int_to_ptr.vmem [resolvable:$true] %s379_s28 }
  0x17   :  { %473 = vmatpush3.bf16.msra.mxu1 %v472_v5  ;;  %449 = vmatprep.mubr.msk.f32.mxu0 %vm554_vm0, %v553_v1  ;;  %v201_v15 = vld [vmem:[%s694_s3 + $0x20] sm:$0xff]  ;;  %v204_v19 = vld [vmem:[%s694_s3 + $0x38] sm:$0xff]  ;;  %v286_v22 = vld [vmem:[%s695_s4 + $0x8] sm:$0xff]  ;;  %p530_p9 = scmp.lt.s32.totalorder %s380_s28, %s380_s28 }
  0x18   :  { %428 = vmatprep.subr.mxu1 %v553_v1  ;;  %476 = vmatpush3.bf16.msra.mxu0 %v475_v10  ;;  %v481_v17 = vpack.c.bf16 %v202_v16, %v201_v15  ;;  %v484_v20 = vpack.c.bf16 %v204_v19, %v203_v18  ;;  %v285_v21 = vld [vmem:[%s695_s4] sm:$0xff]  ;;  %v287_v23 = vld [vmem:[%s695_s4 + $0x10] sm:$0xff]  ;;  %v288_v25 = vld [vmem:[%s695_s4 + $0x18] sm:$0xff] }
  0x19   :  { %477 = vmatprep.subr.bf16.mxu0 %v552_v0  ;;  %v487_v24 = vpack.c.bf16 %v286_v22, %v285_v21  ;;  %v490_v26 = vpack.c.bf16 %v288_v25, %v287_v23  ;;  %v289_v27 = vld [vmem:[%s695_s4 + $0x20] sm:$0xff]  ;;  %v290_v28 = vld [vmem:[%s695_s4 + $0x28] sm:$0xff]  ;;  %v291_v38 = vld [vmem:[%s695_s4 + $0x30] sm:$0xff] }
  0x1a   :  { %v493_v29 = vpack.c.bf16 %v290_v28, %v289_v27  ;;  %v390_v33 = vld [vmem:[%s696_s5] ss:$0 sm:$0xff]  ;;  %v292_v39 = vld [vmem:[%s695_s4 + $0x38] sm:$0xff]  ;;  %v391_v41 = vld [vmem:[%s696_s5 + $0x1] ss:$0 sm:$0xff]  ;;  %s525_s4 = scalar_lea.vmem %s380_s28, 128 }
  0x1b   :  { %429 = vmatpush3.msra.mxu1 %v40_v12  ;;  %v496_v40 = vpack.c.bf16 %v292_v39, %v291_v38  ;;  %v393_v46 = vld [vmem:[%s696_s5 + $0x2] ss:$0 sm:$0xff]  ;;  %p526_p8 = scmp.ne.s32.totalorder %s380_s28, %s525_s4  ;;  %p531_p10 = scmp.lt.s32.totalorder %s525_s4, %s525_s4 }
  0x1c   :  { %431 = vmatmul.mubr.msk.f32.vlgmr.msra.gmra.mrb[0].mxu1 %vm116_vm2, %v36_v13  ;;  %486 = vmatprep.subr.bf16.mxu1 %v552_v0 }
  0x1d   :  { %479 = vmatpush3.bf16.msra.mxu0 %v478_v14  ;;  %468 = vmatprep.mubr.msk.f32.mxu1 %vm554_vm0, %v553_v1  ;;  %p532_p11 = por %p531_p10, %p530_p9 }
  0x1e   :  { %480 = vmatprep.subr.bf16.mxu0 %v552_v0  ;;  %488 = vmatpush3.bf16.msra.mxu1 %v487_v24 }
  0x1f   :  { %489 = vmatprep.subr.bf16.mxu1 %v552_v0  ;;  %p533_p12 = pnand %p532_p11, %p526_p8 }
  0x21   :  { %482 = vmatpush3.bf16.msra.mxu0 %v481_v17 }
  0x22   :  { %483 = vmatprep.subr.bf16.mxu0 %v552_v0  ;;  %491 = vmatpush3.bf16.msra.mxu1 %v490_v26 }
  0x23   :  { %492 = vmatprep.subr.bf16.mxu1 %v552_v0 }
  0x25   :  { %485 = vmatpush3.bf16.msra.mxu0 %v484_v20 }
  0x26   :  { %494 = vmatpush3.bf16.msra.mxu1 %v493_v29 }
  0x27   :  { %495 = vmatprep.subr.bf16.mxu1 %v552_v0 }
  0x2a   :  { %497 = vmatpush3.bf16.msra.mxu1 %v496_v40 }
  0xe9   :  { %v112_v30 = vpop.f32.mrb[0].mxu0 }
  0xea   :  { %v423_v31 = vpop.f32.mrb[1].mxu0 }
  0xef   :  { %v186_v32 = vpop.f32.mrb[0].mxu1 }
  0xf0   :  { %v187_v34 = vadd.f32 %v186_v32, %v112_v30  ;;  %v432_v35 = vpop.f32.mrb[1].mxu1 }
  0xf2   :  { %v195_v36 = vadd.f32 %v390_v33, %v187_v34 }
  0xf4   :  { %v196_v37 = vmax.f32 %v195_v36, 0.0 }
  0xf6   :  { %450 = vmatmul.mubr.msk.f32.vlgmr.msra.gmra.mrb[2].mxu0 %vm210_vm3, %v196_v37 }
 0x1c9   :  { %v280_v42 = vpop.f32.mrb[2].mxu0 }
 0x1ca   :  { %v281_v43 = vadd.f32 %v391_v41, %v280_v42  ;;  %v451_v44 = vpop.f32.mrb[3].mxu0 }
 0x1cc   :  { %v284_v45 = vmax.f32 %v281_v43, 0.0 }
 0x1ce   :  { %469 = vmatmul.mubr.msk.f32.vlgmr.msra.gmra.mrb[2].mxu1 %vm210_vm3, %v284_v45 }
 0x2a1   :  { %v367_v47 = vpop.f32.mrb[2].mxu1 }
 0x2a2   :  { %v368_v48 = vadd.f32 %v393_v46, %v367_v47  ;;  %v470_v49 = vpop.f32.mrb[3].mxu1 }
 0x2a4   :  { %372 = vst.msk [vmem:[#allocation5] sm:$0xff] %vm371_vm4, %v368_v48 }
 0x2a5   :  { %536 = shalt.err (!%p533_p12)
}
 0x2a6   :  { %s537_s30 = scalar_lea.hbm %s697_s6, 128 }
 0x2a7   :  { %p538_p13 = scmp.ne.s32.totalorder %s697_s6, %s537_s30  ;;  %p541_p0 = scmp.lt.u32.totalorder %s537_s30, %s697_s6 }
 0x2a9   :  { %p543_p1 = pnand %p541_p0, %p538_p13 }
 0x2ab   :  { %546 = shalt.err (!%p543_p1)
}
 0x2ac   :  { %382 = dma.vmem_to_hbm [thread:$0]  %s380_s28, 128, %s697_s6, [#allocation4]  }
 0x2ad   :  { %549 = dma.done.wait [#allocation4], 128  }
 0x2ae   :  { %550 = vsyncadd [#allocation4], 4294967168 }
 0x2af   :  { %386 = vsyncpa [#allocation3], 1 }
 0x2b0   :  { %387 = vsyncpa [#allocation4], 1 }

</bundles_post_ra>
